<compile_context>
chip_gen: v7x
topology: tpu7x:2x2x1
jax: 0.10.0
libtpu: 0.0.40
codegen_flags: <defaults>
</compile_context>

<pallas_src>
import functools

import numpy as np
import jax
import jax.numpy as jnp
from jax.experimental import pallas as pl
from jax.experimental.pallas import tpu as pltpu

_BRIGHT, _CONTRAST, _SAT, _HUE = 0, 1, 2, 3


# ----------------------------------------------------------------------------
# Elementwise colour ops (traced inside the kernel, pure VPU work)
# ----------------------------------------------------------------------------
def _adjust_saturation(r, g, b, sf):
    # HSV saturation scaling with H,V fixed is exactly a lerp toward maxc:
    #   c = v*(1 - s*k)  =>  c(s*sf) = maxc - sf*(maxc - c)
    maxc = jnp.maximum(jnp.maximum(r, g), b)
    r = jnp.clip(maxc - sf * (maxc - r), 0.0, 1.0)
    g = jnp.clip(maxc - sf * (maxc - g), 0.0, 1.0)
    b = jnp.clip(maxc - sf * (maxc - b), 0.0, 1.0)
    return r, g, b


def _adjust_hue(r, g, b, hf):
    # RGB -> (h, maxc, delta); shift h; branchless back-conversion.
    maxc = jnp.maximum(jnp.maximum(r, g), b)
    minc = jnp.minimum(jnp.minimum(r, g), b)
    delta = maxc - minc
    inv_d = 1.0 / jnp.where(delta > 0.0, delta, 1.0)
    rc = (maxc - r) * inv_d
    gc = (maxc - g) * inv_d
    bc = (maxc - b) * inv_d
    h = jnp.where(maxc == r, bc - gc,
                  jnp.where(maxc == g, 2.0 + rc - bc, 4.0 + gc - rc))
    h = h * (1.0 / 6.0) + hf
    h = h - jnp.floor(h)                    # wrap to [0, 1)
    h6 = h * 6.0
    # Branchless hue->RGB' (equivalent to the piecewise sector formula).
    rp = jnp.clip(jnp.abs(h6 - 3.0) - 1.0, 0.0, 1.0)
    gp = jnp.clip(2.0 - jnp.abs(h6 - 2.0), 0.0, 1.0)
    bp = jnp.clip(2.0 - jnp.abs(h6 - 4.0), 0.0, 1.0)
    # c = v*(1 - s*(1 - c')) = maxc - delta*(1 - c'); on gray (delta==0) this
    # returns maxc regardless of h, matching "hue undefined on gray".
    r = jnp.clip(maxc - delta * (1.0 - rp), 0.0, 1.0)
    g = jnp.clip(maxc - delta * (1.0 - gp), 0.0, 1.0)
    b = jnp.clip(maxc - delta * (1.0 - bp), 0.0, 1.0)
    return r, g, b


# ----------------------------------------------------------------------------
# Pallas kernel: one (3, th, W) row-tile per grid step, fully fused jiggle
# ----------------------------------------------------------------------------
def _make_jiggle_kernel(order):
    # `order` is a static python tuple (permutation of the 4 ops) -> unrolled.
    def kernel(params_ref, img_ref, out_ref):
        # params_ref: (4, N) f32 in SMEM   img_ref/out_ref: (3, th, W) in VMEM
        n = pl.program_id(0)
        bf = params_ref[_BRIGHT, n]
        cf = params_ref[_CONTRAST, n]
        sf = params_ref[_SAT, n]
        hf = params_ref[_HUE, n]

        # [-1, 1] -> [0, 1]
        r = img_ref[0, :, :] * 0.5 + 0.5
        g = img_ref[1, :, :] * 0.5 + 0.5
        b = img_ref[2, :, :] * 0.5 + 0.5

        # TODO(synk): not guaranteed bit-identical to kornia's rgb<->hsv
        # implementation (tie-breaking / eps conventions may differ slightly).
        for op in order:
            if op == _BRIGHT:        # kornia ColorJiggle: additive (factor-1)
                shift = bf - 1.0
                r = jnp.clip(r + shift, 0.0, 1.0)
                g = jnp.clip(g + shift, 0.0, 1.0)
                b = jnp.clip(b + shift, 0.0, 1.0)
            elif op == _CONTRAST:    # kornia ColorJiggle: multiplicative
                r = jnp.clip(r * cf, 0.0, 1.0)
                g = jnp.clip(g * cf, 0.0, 1.0)
                b = jnp.clip(b * cf, 0.0, 1.0)
            elif op == _SAT:
                r, g, b = _adjust_saturation(r, g, b, sf)
            else:                    # _HUE
                r, g, b = _adjust_hue(r, g, b, hf)

        # [0, 1] -> [-1, 1]
        out_ref[0, :, :] = (r * 2.0 - 1.0).astype(out_ref.dtype)
        out_ref[1, :, :] = (g * 2.0 - 1.0).astype(out_ref.dtype)
        out_ref[2, :, :] = (b * 2.0 - 1.0).astype(out_ref.dtype)

    return kernel


def _pick_tile_h(H, W, channels=3, dtype_bytes=4, budget=8 << 20):
    """Largest row-tile whose in+out double buffers stay under ~budget bytes."""
    max_rows = max(1, budget // (4 * channels * W * dtype_bytes))
    if H <= max_rows:
        return H
    # Need th % 8 == 0 (sublane tiling) unless th == H; pick largest divisor.
    for cand in range(min(H, max_rows), 0, -1):
        if H % cand == 0 and cand % 8 == 0:
            return cand
    return H  # fallback: whole image (rare; relies on default VMEM limit)


@functools.partial(jax.jit, static_argnames=("order",))
def pallas_color_jiggle(params, img, *, order):
    """params: (4, N) f32 per-sample factors; img: (N, 3, H, W) in [-1, 1]."""
    N, C, H, W = img.shape
    th = _pick_tile_h(H, W, C, jnp.dtype(img.dtype).itemsize)
    kernel = _make_jiggle_kernel(order)
    return pl.pallas_call(
        kernel,
        out_shape=jax.ShapeDtypeStruct(img.shape, img.dtype),
        grid_spec=pltpu.PrefetchScalarGridSpec(
            num_scalar_prefetch=0,
            grid=(N, H // th),
            in_specs=[
                # tiny per-sample factor table -> SMEM (scalar reads in kernel)
                pl.BlockSpec(memory_space=pltpu.MemorySpace.SMEM),
                # one (3, th, W) row-tile of a single image per grid step
                pl.BlockSpec((pl.Squeezed(), C, th, W),
                             lambda n, h: (n, 0, h, 0)),
            ],
            out_specs=pl.BlockSpec((pl.Squeezed(), C, th, W),
                                   lambda n, h: (n, 0, h, 0)),
        ),
        compiler_params=pltpu.CompilerParams(
            dimension_semantics=("parallel", "parallel")),
    )(params, img)


# ----------------------------------------------------------------------------
# ColorJitter module equivalent
# ----------------------------------------------------------------------------
class ColorJitter:
    """x in [-1,1] -> normalize -> ColorJiggle(b,c,s,h, p=1) -> back to [-1,1]."""

    def __init__(self, brightness=(0.7, 1.3), contrast=(0.8, 1.25),
                 saturation=(0.8, 1.25), hue=(-0.2, 0.2), seed=0):
        self.brightness = brightness
        self.contrast = contrast
        self.saturation = saturation
        self.hue = hue
        self._key = jax.random.PRNGKey(seed)
        self._order_rng = np.random.RandomState(seed)

    def __call__(self, noised_and_cover):
        img = noised_and_cover[0]                     # (N, 3, H, W) in [-1, 1]
        N, C, H, W = img.shape
        assert C == 3, "ColorJitter expects RGB (N, 3, H, W) images"

        # Per-sample random factors (traced arrays -> never retrace/recompile).
        self._key, kb, kc, ks, kh = jax.random.split(self._key, 5)
        bf = jax.random.uniform(kb, (N,), jnp.float32, *self.brightness)
        cf = jax.random.uniform(kc, (N,), jnp.float32, *self.contrast)
        sf = jax.random.uniform(ks, (N,), jnp.float32, *self.saturation)
        hf = jax.random.uniform(kh, (N,), jnp.float32, *self.hue)
        params = jnp.stack([bf, cf, sf, hf], axis=0)  # (4, N)

        # Batch-wide random op order (as in kornia ColorJiggle); static arg,
        # at most 24 distinct compiled variants, cached by jax.jit.
        order = tuple(int(v) for v in self._order_rng.permutation(4))

        noised_and_cover[0] = pallas_color_jiggle(params, img, order=order)
        return noised_and_cover


# ----------------------------------------------------------------------------
if __name__ == "__main__":
    key = jax.random.PRNGKey(0)
    # Small RGB batch, lane-dense last dim (multiple of 128).
    N, C, H, W = 2, 3, 32, 128
    x = jax.random.uniform(key, (N, C, H, W), dtype=jnp.float32,
                           minval=-1.0, maxval=1.0)

    layer = ColorJitter(seed=0)
    out = layer([x])[0]
    out = jax.block_until_ready(out)

    assert out.shape == (N, C, H, W), out.shape
    assert out.dtype == jnp.float32
    assert bool(jnp.all(jnp.isfinite(out)))
    # Every jiggle op clamps to [0,1] in normalized space -> output in [-1,1].
    assert float(out.min()) >= -1.0 - 1e-5
    assert float(out.max()) <= 1.0 + 1e-5

    print("KERNEL_OK")
</pallas_src>

<mosaic_0001>
module attributes {stable_mosaic.version = 11 : i64} {
  func.func @kernel(%arg0: i32, %arg1: i32, %arg2: memref<4x2xf32, #tpu.memory_space<smem>>, %arg3: memref<1x3x32x128xf32, #tpu.memory_space<vmem>>, %arg4: memref<1x3x32x128xf32, #tpu.memory_space<vmem>>) attributes {dimension_semantics = [#tpu.dimension_semantics<parallel>, #tpu.dimension_semantics<parallel>], iteration_bounds = array<i64: 2, 1>, scalar_prefetch = 0 : i64, scratch_operands = 0 : i64, tpu.core_type = #tpu.core_type<tc>, window_params = [{transform_indices = @transform_0, window_bounds = array<i64: 4, 2>}, {transform_indices = @transform_1, window_bounds = array<i64: 1, 3, 32, 128>}, {transform_indices = @transform_2, window_bounds = array<i64: 1, 3, 32, 128>}]} {
    %c0 = arith.constant 0 : index
    %0 = arith.index_cast %arg0 : i32 to index
    %1 = memref.load %arg2[%c0, %0] : memref<4x2xf32, #tpu.memory_space<smem>>
    %c1 = arith.constant 1 : index
    %2 = arith.index_cast %arg0 : i32 to index
    %3 = memref.load %arg2[%c1, %2] : memref<4x2xf32, #tpu.memory_space<smem>>
    %c2 = arith.constant 2 : index
    %4 = arith.index_cast %arg0 : i32 to index
    %5 = memref.load %arg2[%c2, %4] : memref<4x2xf32, #tpu.memory_space<smem>>
    %c3 = arith.constant 3 : index
    %6 = arith.index_cast %arg0 : i32 to index
    %7 = memref.load %arg2[%c3, %6] : memref<4x2xf32, #tpu.memory_space<smem>>
    %c0_0 = arith.constant 0 : index
    %c0_1 = arith.constant 0 : index
    %c0_2 = arith.constant 0 : index
    %c0_3 = arith.constant 0 : index
    %8 = vector.load %arg3[%c0_0, %c0_1, %c0_2, %c0_3] : memref<1x3x32x128xf32, #tpu.memory_space<vmem>>, vector<1x1x32x128xf32>
    %9 = vector.shape_cast %8 : vector<1x1x32x128xf32> to vector<32x128xf32>
    %cst = arith.constant 5.000000e-01 : f32
    %10 = vector.broadcast %cst : f32 to vector<32x128xf32>
    %11 = arith.mulf %9, %10 : vector<32x128xf32>
    %cst_4 = arith.constant 5.000000e-01 : f32
    %12 = vector.broadcast %cst_4 : f32 to vector<32x128xf32>
    %13 = arith.addf %11, %12 : vector<32x128xf32>
    %c0_5 = arith.constant 0 : index
    %c1_6 = arith.constant 1 : index
    %c0_7 = arith.constant 0 : index
    %c0_8 = arith.constant 0 : index
    %14 = vector.load %arg3[%c0_5, %c1_6, %c0_7, %c0_8] : memref<1x3x32x128xf32, #tpu.memory_space<vmem>>, vector<1x1x32x128xf32>
    %15 = vector.shape_cast %14 : vector<1x1x32x128xf32> to vector<32x128xf32>
    %cst_9 = arith.constant 5.000000e-01 : f32
    %16 = vector.broadcast %cst_9 : f32 to vector<32x128xf32>
    %17 = arith.mulf %15, %16 : vector<32x128xf32>
    %cst_10 = arith.constant 5.000000e-01 : f32
    %18 = vector.broadcast %cst_10 : f32 to vector<32x128xf32>
    %19 = arith.addf %17, %18 : vector<32x128xf32>
    %c0_11 = arith.constant 0 : index
    %c2_12 = arith.constant 2 : index
    %c0_13 = arith.constant 0 : index
    %c0_14 = arith.constant 0 : index
    %20 = vector.load %arg3[%c0_11, %c2_12, %c0_13, %c0_14] : memref<1x3x32x128xf32, #tpu.memory_space<vmem>>, vector<1x1x32x128xf32>
    %21 = vector.shape_cast %20 : vector<1x1x32x128xf32> to vector<32x128xf32>
    %cst_15 = arith.constant 5.000000e-01 : f32
    %22 = vector.broadcast %cst_15 : f32 to vector<32x128xf32>
    %23 = arith.mulf %21, %22 : vector<32x128xf32>
    %cst_16 = arith.constant 5.000000e-01 : f32
    %24 = vector.broadcast %cst_16 : f32 to vector<32x128xf32>
    %25 = arith.addf %23, %24 : vector<32x128xf32>
    %26 = arith.maximumf %13, %19 : vector<32x128xf32>
    %27 = arith.maximumf %26, %25 : vector<32x128xf32>
    %28 = arith.subf %27, %13 : vector<32x128xf32>
    %29 = vector.broadcast %5 : f32 to vector<32x128xf32>
    %30 = arith.mulf %29, %28 : vector<32x128xf32>
    %31 = arith.subf %27, %30 : vector<32x128xf32>
    %cst_17 = arith.constant 0.000000e+00 : f32
    %cst_18 = arith.constant 1.000000e+00 : f32
    %32 = vector.broadcast %cst_17 : f32 to vector<32x128xf32>
    %33 = arith.maximumf %32, %31 : vector<32x128xf32>
    %34 = vector.broadcast %cst_18 : f32 to vector<32x128xf32>
    %35 = arith.minimumf %34, %33 : vector<32x128xf32>
    %36 = arith.subf %27, %19 : vector<32x128xf32>
    %37 = vector.broadcast %5 : f32 to vector<32x128xf32>
    %38 = arith.mulf %37, %36 : vector<32x128xf32>
    %39 = arith.subf %27, %38 : vector<32x128xf32>
    %cst_19 = arith.constant 0.000000e+00 : f32
    %cst_20 = arith.constant 1.000000e+00 : f32
    %40 = vector.broadcast %cst_19 : f32 to vector<32x128xf32>
    %41 = arith.maximumf %40, %39 : vector<32x128xf32>
    %42 = vector.broadcast %cst_20 : f32 to vector<32x128xf32>
    %43 = arith.minimumf %42, %41 : vector<32x128xf32>
    %44 = arith.subf %27, %25 : vector<32x128xf32>
    %45 = vector.broadcast %5 : f32 to vector<32x128xf32>
    %46 = arith.mulf %45, %44 : vector<32x128xf32>
    %47 = arith.subf %27, %46 : vector<32x128xf32>
    %cst_21 = arith.constant 0.000000e+00 : f32
    %cst_22 = arith.constant 1.000000e+00 : f32
    %48 = vector.broadcast %cst_21 : f32 to vector<32x128xf32>
    %49 = arith.maximumf %48, %47 : vector<32x128xf32>
    %50 = vector.broadcast %cst_22 : f32 to vector<32x128xf32>
    %51 = arith.minimumf %50, %49 : vector<32x128xf32>
    %52 = arith.maximumf %35, %43 : vector<32x128xf32>
    %53 = arith.maximumf %52, %51 : vector<32x128xf32>
    %54 = arith.minimumf %35, %43 : vector<32x128xf32>
    %55 = arith.minimumf %54, %51 : vector<32x128xf32>
    %56 = arith.subf %53, %55 : vector<32x128xf32>
    %cst_23 = arith.constant 0.000000e+00 : f32
    %57 = vector.broadcast %cst_23 : f32 to vector<32x128xf32>
    %58 = arith.cmpf ogt, %56, %57 : vector<32x128xf32>
    %cst_24 = arith.constant 1.000000e+00 : f32
    %59 = vector.broadcast %cst_24 : f32 to vector<32x128xf32>
    %60 = arith.select %58, %56, %59 : vector<32x128xi1>, vector<32x128xf32>
    %cst_25 = arith.constant 1.000000e+00 : f32
    %61 = vector.broadcast %cst_25 : f32 to vector<32x128xf32>
    %62 = arith.divf %61, %60 : vector<32x128xf32>
    %63 = arith.subf %53, %35 : vector<32x128xf32>
    %64 = arith.mulf %63, %62 : vector<32x128xf32>
    %65 = arith.subf %53, %43 : vector<32x128xf32>
    %66 = arith.mulf %65, %62 : vector<32x128xf32>
    %67 = arith.subf %53, %51 : vector<32x128xf32>
    %68 = arith.mulf %67, %62 : vector<32x128xf32>
    %69 = arith.cmpf oeq, %53, %35 : vector<32x128xf32>
    %70 = arith.subf %68, %66 : vector<32x128xf32>
    %71 = arith.cmpf oeq, %53, %43 : vector<32x128xf32>
    %cst_26 = arith.constant 2.000000e+00 : f32
    %72 = vector.broadcast %cst_26 : f32 to vector<32x128xf32>
    %73 = arith.addf %72, %64 : vector<32x128xf32>
    %74 = arith.subf %73, %68 : vector<32x128xf32>
    %cst_27 = arith.constant 4.000000e+00 : f32
    %75 = vector.broadcast %cst_27 : f32 to vector<32x128xf32>
    %76 = arith.addf %75, %66 : vector<32x128xf32>
    %77 = arith.subf %76, %64 : vector<32x128xf32>
    %78 = arith.select %71, %74, %77 : vector<32x128xi1>, vector<32x128xf32>
    %79 = arith.select %69, %70, %78 : vector<32x128xi1>, vector<32x128xf32>
    %cst_28 = arith.constant 0.166666672 : f32
    %80 = vector.broadcast %cst_28 : f32 to vector<32x128xf32>
    %81 = arith.mulf %79, %80 : vector<32x128xf32>
    %82 = vector.broadcast %7 : f32 to vector<32x128xf32>
    %83 = arith.addf %81, %82 : vector<32x128xf32>
    %84 = math.floor %83 : vector<32x128xf32>
    %85 = arith.subf %83, %84 : vector<32x128xf32>
    %cst_29 = arith.constant 6.000000e+00 : f32
    %86 = vector.broadcast %cst_29 : f32 to vector<32x128xf32>
    %87 = arith.mulf %85, %86 : vector<32x128xf32>
    %cst_30 = arith.constant 3.000000e+00 : f32
    %88 = vector.broadcast %cst_30 : f32 to vector<32x128xf32>
    %89 = arith.subf %87, %88 : vector<32x128xf32>
    %90 = math.absf %89 : vector<32x128xf32>
    %cst_31 = arith.constant 1.000000e+00 : f32
    %91 = vector.broadcast %cst_31 : f32 to vector<32x128xf32>
    %92 = arith.subf %90, %91 : vector<32x128xf32>
    %cst_32 = arith.constant 0.000000e+00 : f32
    %cst_33 = arith.constant 1.000000e+00 : f32
    %93 = vector.broadcast %cst_32 : f32 to vector<32x128xf32>
    %94 = arith.maximumf %93, %92 : vector<32x128xf32>
    %95 = vector.broadcast %cst_33 : f32 to vector<32x128xf32>
    %96 = arith.minimumf %95, %94 : vector<32x128xf32>
    %cst_34 = arith.constant 2.000000e+00 : f32
    %97 = vector.broadcast %cst_34 : f32 to vector<32x128xf32>
    %98 = arith.subf %87, %97 : vector<32x128xf32>
    %99 = math.absf %98 : vector<32x128xf32>
    %cst_35 = arith.constant 2.000000e+00 : f32
    %100 = vector.broadcast %cst_35 : f32 to vector<32x128xf32>
    %101 = arith.subf %100, %99 : vector<32x128xf32>
    %cst_36 = arith.constant 0.000000e+00 : f32
    %cst_37 = arith.constant 1.000000e+00 : f32
    %102 = vector.broadcast %cst_36 : f32 to vector<32x128xf32>
    %103 = arith.maximumf %102, %101 : vector<32x128xf32>
    %104 = vector.broadcast %cst_37 : f32 to vector<32x128xf32>
    %105 = arith.minimumf %104, %103 : vector<32x128xf32>
    %cst_38 = arith.constant 4.000000e+00 : f32
    %106 = vector.broadcast %cst_38 : f32 to vector<32x128xf32>
    %107 = arith.subf %87, %106 : vector<32x128xf32>
    %108 = math.absf %107 : vector<32x128xf32>
    %cst_39 = arith.constant 2.000000e+00 : f32
    %109 = vector.broadcast %cst_39 : f32 to vector<32x128xf32>
    %110 = arith.subf %109, %108 : vector<32x128xf32>
    %cst_40 = arith.constant 0.000000e+00 : f32
    %cst_41 = arith.constant 1.000000e+00 : f32
    %111 = vector.broadcast %cst_40 : f32 to vector<32x128xf32>
    %112 = arith.maximumf %111, %110 : vector<32x128xf32>
    %113 = vector.broadcast %cst_41 : f32 to vector<32x128xf32>
    %114 = arith.minimumf %113, %112 : vector<32x128xf32>
    %cst_42 = arith.constant 1.000000e+00 : f32
    %115 = vector.broadcast %cst_42 : f32 to vector<32x128xf32>
    %116 = arith.subf %115, %96 : vector<32x128xf32>
    %117 = arith.mulf %56, %116 : vector<32x128xf32>
    %118 = arith.subf %53, %117 : vector<32x128xf32>
    %cst_43 = arith.constant 0.000000e+00 : f32
    %cst_44 = arith.constant 1.000000e+00 : f32
    %119 = vector.broadcast %cst_43 : f32 to vector<32x128xf32>
    %120 = arith.maximumf %119, %118 : vector<32x128xf32>
    %121 = vector.broadcast %cst_44 : f32 to vector<32x128xf32>
    %122 = arith.minimumf %121, %120 : vector<32x128xf32>
    %cst_45 = arith.constant 1.000000e+00 : f32
    %123 = vector.broadcast %cst_45 : f32 to vector<32x128xf32>
    %124 = arith.subf %123, %105 : vector<32x128xf32>
    %125 = arith.mulf %56, %124 : vector<32x128xf32>
    %126 = arith.subf %53, %125 : vector<32x128xf32>
    %cst_46 = arith.constant 0.000000e+00 : f32
    %cst_47 = arith.constant 1.000000e+00 : f32
    %127 = vector.broadcast %cst_46 : f32 to vector<32x128xf32>
    %128 = arith.maximumf %127, %126 : vector<32x128xf32>
    %129 = vector.broadcast %cst_47 : f32 to vector<32x128xf32>
    %130 = arith.minimumf %129, %128 : vector<32x128xf32>
    %cst_48 = arith.constant 1.000000e+00 : f32
    %131 = vector.broadcast %cst_48 : f32 to vector<32x128xf32>
    %132 = arith.subf %131, %114 : vector<32x128xf32>
    %133 = arith.mulf %56, %132 : vector<32x128xf32>
    %134 = arith.subf %53, %133 : vector<32x128xf32>
    %cst_49 = arith.constant 0.000000e+00 : f32
    %cst_50 = arith.constant 1.000000e+00 : f32
    %135 = vector.broadcast %cst_49 : f32 to vector<32x128xf32>
    %136 = arith.maximumf %135, %134 : vector<32x128xf32>
    %137 = vector.broadcast %cst_50 : f32 to vector<32x128xf32>
    %138 = arith.minimumf %137, %136 : vector<32x128xf32>
    %139 = vector.broadcast %3 : f32 to vector<32x128xf32>
    %140 = arith.mulf %122, %139 : vector<32x128xf32>
    %cst_51 = arith.constant 0.000000e+00 : f32
    %cst_52 = arith.constant 1.000000e+00 : f32
    %141 = vector.broadcast %cst_51 : f32 to vector<32x128xf32>
    %142 = arith.maximumf %141, %140 : vector<32x128xf32>
    %143 = vector.broadcast %cst_52 : f32 to vector<32x128xf32>
    %144 = arith.minimumf %143, %142 : vector<32x128xf32>
    %145 = vector.broadcast %3 : f32 to vector<32x128xf32>
    %146 = arith.mulf %130, %145 : vector<32x128xf32>
    %cst_53 = arith.constant 0.000000e+00 : f32
    %cst_54 = arith.constant 1.000000e+00 : f32
    %147 = vector.broadcast %cst_53 : f32 to vector<32x128xf32>
    %148 = arith.maximumf %147, %146 : vector<32x128xf32>
    %149 = vector.broadcast %cst_54 : f32 to vector<32x128xf32>
    %150 = arith.minimumf %149, %148 : vector<32x128xf32>
    %151 = vector.broadcast %3 : f32 to vector<32x128xf32>
    %152 = arith.mulf %138, %151 : vector<32x128xf32>
    %cst_55 = arith.constant 0.000000e+00 : f32
    %cst_56 = arith.constant 1.000000e+00 : f32
    %153 = vector.broadcast %cst_55 : f32 to vector<32x128xf32>
    %154 = arith.maximumf %153, %152 : vector<32x128xf32>
    %155 = vector.broadcast %cst_56 : f32 to vector<32x128xf32>
    %156 = arith.minimumf %155, %154 : vector<32x128xf32>
    %cst_57 = arith.constant 1.000000e+00 : f32
    %157 = arith.subf %1, %cst_57 : f32
    %158 = vector.broadcast %157 : f32 to vector<32x128xf32>
    %159 = arith.addf %144, %158 : vector<32x128xf32>
    %cst_58 = arith.constant 0.000000e+00 : f32
    %cst_59 = arith.constant 1.000000e+00 : f32
    %160 = vector.broadcast %cst_58 : f32 to vector<32x128xf32>
    %161 = arith.maximumf %160, %159 : vector<32x128xf32>
    %162 = vector.broadcast %cst_59 : f32 to vector<32x128xf32>
    %163 = arith.minimumf %162, %161 : vector<32x128xf32>
    %164 = vector.broadcast %157 : f32 to vector<32x128xf32>
    %165 = arith.addf %150, %164 : vector<32x128xf32>
    %cst_60 = arith.constant 0.000000e+00 : f32
    %cst_61 = arith.constant 1.000000e+00 : f32
    %166 = vector.broadcast %cst_60 : f32 to vector<32x128xf32>
    %167 = arith.maximumf %166, %165 : vector<32x128xf32>
    %168 = vector.broadcast %cst_61 : f32 to vector<32x128xf32>
    %169 = arith.minimumf %168, %167 : vector<32x128xf32>
    %170 = vector.broadcast %157 : f32 to vector<32x128xf32>
    %171 = arith.addf %156, %170 : vector<32x128xf32>
    %cst_62 = arith.constant 0.000000e+00 : f32
    %cst_63 = arith.constant 1.000000e+00 : f32
    %172 = vector.broadcast %cst_62 : f32 to vector<32x128xf32>
    %173 = arith.maximumf %172, %171 : vector<32x128xf32>
    %174 = vector.broadcast %cst_63 : f32 to vector<32x128xf32>
    %175 = arith.minimumf %174, %173 : vector<32x128xf32>
    %cst_64 = arith.constant 2.000000e+00 : f32
    %176 = vector.broadcast %cst_64 : f32 to vector<32x128xf32>
    %177 = arith.mulf %163, %176 : vector<32x128xf32>
    %cst_65 = arith.constant 1.000000e+00 : f32
    %178 = vector.broadcast %cst_65 : f32 to vector<32x128xf32>
    %179 = arith.subf %177, %178 : vector<32x128xf32>
    %c0_66 = arith.constant 0 : index
    %c0_67 = arith.constant 0 : index
    %c0_68 = arith.constant 0 : index
    %c0_69 = arith.constant 0 : index
    %180 = vector.load %arg4[%c0_66, %c0_67, %c0_68, %c0_69] : memref<1x3x32x128xf32, #tpu.memory_space<vmem>>, vector<1x1x32x128xf32>
    %181 = vector.shape_cast %180 : vector<1x1x32x128xf32> to vector<32x128xf32>
    %182 = vector.shape_cast %179 : vector<32x128xf32> to vector<1x1x32x128xf32>
    tpu.vector_store %arg4[%c0_66, %c0_67, %c0_68, %c0_69], %182 {strides = array<i32>} : memref<1x3x32x128xf32, #tpu.memory_space<vmem>>, vector<1x1x32x128xf32>,
    %cst_70 = arith.constant 2.000000e+00 : f32
    %183 = vector.broadcast %cst_70 : f32 to vector<32x128xf32>
    %184 = arith.mulf %169, %183 : vector<32x128xf32>
    %cst_71 = arith.constant 1.000000e+00 : f32
    %185 = vector.broadcast %cst_71 : f32 to vector<32x128xf32>
    %186 = arith.subf %184, %185 : vector<32x128xf32>
    %c0_72 = arith.constant 0 : index
    %c1_73 = arith.constant 1 : index
    %c0_74 = arith.constant 0 : index
    %c0_75 = arith.constant 0 : index
    %187 = vector.load %arg4[%c0_72, %c1_73, %c0_74, %c0_75] : memref<1x3x32x128xf32, #tpu.memory_space<vmem>>, vector<1x1x32x128xf32>
    %188 = vector.shape_cast %187 : vector<1x1x32x128xf32> to vector<32x128xf32>
    %189 = vector.shape_cast %186 : vector<32x128xf32> to vector<1x1x32x128xf32>
    tpu.vector_store %arg4[%c0_72, %c1_73, %c0_74, %c0_75], %189 {strides = array<i32>} : memref<1x3x32x128xf32, #tpu.memory_space<vmem>>, vector<1x1x32x128xf32>,
    %cst_76 = arith.constant 2.000000e+00 : f32
    %190 = vector.broadcast %cst_76 : f32 to vector<32x128xf32>
    %191 = arith.mulf %175, %190 : vector<32x128xf32>
    %cst_77 = arith.constant 1.000000e+00 : f32
    %192 = vector.broadcast %cst_77 : f32 to vector<32x128xf32>
    %193 = arith.subf %191, %192 : vector<32x128xf32>
    %c0_78 = arith.constant 0 : index
    %c2_79 = arith.constant 2 : index
    %c0_80 = arith.constant 0 : index
    %c0_81 = arith.constant 0 : index
    %194 = vector.load %arg4[%c0_78, %c2_79, %c0_80, %c0_81] : memref<1x3x32x128xf32, #tpu.memory_space<vmem>>, vector<1x1x32x128xf32>
    %195 = vector.shape_cast %194 : vector<1x1x32x128xf32> to vector<32x128xf32>
    %196 = vector.shape_cast %193 : vector<32x128xf32> to vector<1x1x32x128xf32>
    tpu.vector_store %arg4[%c0_78, %c2_79, %c0_80, %c0_81], %196 {strides = array<i32>} : memref<1x3x32x128xf32, #tpu.memory_space<vmem>>, vector<1x1x32x128xf32>,
    return
  }
  func.func @transform_0(%arg0: i32, %arg1: i32) -> (i32, i32) {
    %c0_i32 = arith.constant 0 : i32
    %c0_i32_0 = arith.constant 0 : i32
    %c0_i32_1 = arith.constant 0 : i32
    return %c0_i32, %c0_i32_0 : i32, i32
  }
  func.func @transform_1(%arg0: i32, %arg1: i32) -> (i32, i32, i32, i32) {
    %c0_i32 = arith.constant 0 : i32
    %c0_i32_0 = arith.constant 0 : i32
    %c0_i32_1 = arith.constant 0 : i32
    return %arg0, %c0_i32, %arg1, %c0_i32_0 : i32, i32, i32, i32
  }
  func.func @transform_2(%arg0: i32, %arg1: i32) -> (i32, i32, i32, i32) {
    %c0_i32 = arith.constant 0 : i32
    %c0_i32_0 = arith.constant 0 : i32
    %c0_i32_1 = arith.constant 0 : i32
    return %arg0, %c0_i32, %arg1, %c0_i32_0 : i32, i32, i32, i32
  }
}

</mosaic_0001>

<bundles_post_ra>
// kernel: pallas_color_jiggle.1
= control target key start
LH: loop header
LB: loop body
LE: loop exit
PB: predicated region body
PF: predicated region fallthrough
CT: control target
= control target key end

     0   :  { %7 = vsyncpa [#allocation5], 0  ;;  %s1602_s0 = inlined_call_operand.vmem [shape: f32[4,2], index: 0, kind: input, shape index: {}]   ;;  %s1603_s1 = inlined_call_operand.hbm [shape: f32[2,3,32,128], index: 1, kind: input, shape index: {}]   ;;  %s1604_s2 = inlined_call_operand.hbm [shape: f32[2,3,32,128], index: 2, kind: output, shape index: {}]  }
   0x1   :  { %8 = vsyncpa [#allocation3], 0 }
   0x2   :  { %10 = vsyncpa [#allocation3 + $0x1], 0 }
   0x3   :  { %11 = vsyncpa [#allocation4], 0 }
   0x4   :  { %13 = vsyncpa [#allocation4 + $0x1], 0  ;;  %s1094_s9 = smov 0   ;;  %s1096_s10 = smov 0  }
   0x5   :  { %s1098_s11 = smov 0   ;;  %s1100_s12 = smov 0  }
   0x6   :  { %s1102_s13 = smov 0   ;;  %s1104_s14 = smov 0  }
   0x7 LB: > { %s785_s15 = sadd.s32 4294967295, %s1070_s14   ;;  %s786_s16 = sadd.s32 4294967294, %s1070_s14   ;;  %s1070_s14 = sphi %s1104_s14, %s19_s14   ;;  %s1066_s13 = sphi %s1102_s13, %s1627_s13   ;;  %s1062_s12 = sphi %s1100_s12, %s1626_s12   ;;  %s1058_s11 = sphi %s1098_s11, %s1625_s11   ;;  %s1054_s10 = sphi %s1096_s10, %s1624_s10   ;;  %s1050_s9 = sphi %s1094_s9, %s1623_s9  }
   0x8   : > { %s61_s17 = sadd.s32 1, %s1058_s11  ;;  %p68_p0 = scmp.ne.s32.totalorder %s1058_s11, %s1054_s10 }
   0x9   : > { %p69_p1 = scmp.eq.s32.totalorder %s1070_s14, 0  ;;  %p74_p2 = scmp.ne.s32.totalorder %s1054_s10, %s1050_s9 }
   0xa   : > { %p1132_p3 = scmp.eq.s32.totalorder %s785_s15, 0  ;;  %p100_p4 = scmp.eq.s32.totalorder %s785_s15, 1 }
   0xb   : > { %p1136_p5 = por %p69_p1, %p68_p0  ;;  %p106_p6 = scmp.eq.s32.totalorder %s786_s16, 1 }
   0xc   : > { %s1609_s18 = scalar_select %p1132_p3, 1, 0 }
   0xd   : > { %p1142_p7 = por %p1132_p3, %p74_p2  ;;  %p1146_p8 = por %p100_p4, %p68_p0 }
   0xe   : > { %p1150_p9 = por %p106_p6, %p74_p2  ;;  %p787_p10 = scmp.ge.s32.totalorder %s1070_s14, 1 }
   0xf   : > { %s1611_s20 = scalar_select %p1142_p7, 1, 0 }
  0x10   : > { %s1612_s21 = scalar_select %p1146_p8, 1, 0 }
  0x11   : > { %s1613_s22 = scalar_select %p1150_p9, 1, 0 }
  0x12   : > { %p113_p11 = scmp.lt.s32.totalorder %s1070_s14, 3  ;;  %s126_s25 = sshll.u32 %s1602_s0, 4  ;;  %s127_s25 = int_to_ptr.vmem [resolvable:$true] %s126_s25 }
  0x13   : > { %p875_p0 = scmp.lt.s32.totalorder %s1070_s14, 2  ;;  %s31_s29 = sadd.s32 1, %s1066_s13 }
  0x14   : > { %p1159_p12 = pnand %p787_p10, %p113_p11  ;;  %p1180_p6 = scmp.ge.s32.totalorder %s31_s29, 2 }
  0x15   : > { %p1169_p2 = pnand %p875_p0, %p1136_p5  ;;  %s137_s3 = sand.u32 1, %s1058_s11  }
  0x16   : > { %p862_p1 = pneg %p1159_p12  ;;  %s939_s4 = scalar_lea.vmem %s127_s25, 64 }
  0x17   : > { %p940_p10 = scmp.ne.s32.totalorder %s127_s25, %s939_s4  ;;  %p947_p13 = scmp.lt.s32.totalorder %s127_s25, %s127_s25 }
  0x18   : > { %p1175_p4 = pnand %p862_p1, %p1132_p3  ;;  %p948_p9 = scmp.lt.s32.totalorder %s939_s4, %s939_s4 }
  0x1a   : > { %p941_p11 = pneg %p1175_p4  ;;  %p949_p8 = por %p948_p9, %p947_p13 }
  0x1c   : > { %p942_p5 = pnand %p941_p11, %p940_p10 }
  0x1e   : > { %p943_p0 = pneg %p942_p5 }
  0x20   : > { %p950_p1 = pnand %p949_p8, %p943_p0 }
  0x22   : > { %953 = shalt.err (!%p950_p1)
}
  0x23   : > { %s1072_s5 = smov [#allocation2]   ;;  %s1629_s29 = smov (%p1180_p6, %s31_s29), 0 }
  0x24   : > { %865 = dma.vmem_to_smem (!%p1175_p4), %s127_s25, 64, %s1072_s5, [#allocation5]  }
  0x25   : > { %s850_s6 = smul.u32 96, %s137_s3  ;;  %s56_s7 = ssub.s32 %s1066_s13, %s1629_s29 }
  0x26   : > { %s851_s8 = smul.u32 1536, %s1066_s13  ;;  %p59_p8 = scmp.eq.s32.totalorder %s56_s7, 0 }
  0x27   : > { %s141_s23 = scalar_lea.vmem [#allocation6], %s850_s6  ;;  %s1208_s28 = scalar_lea.sflag [#allocation3], %s137_s3 }
  0x28   : > { %s1199_s19 = scalar_lea.hbm %s1603_s1, %s851_s8  ;;  %s150_s24 = sshll.u32 %s141_s23, 4  ;;  %s1206_s24 = int_to_ptr.vmem [resolvable:$true] %s150_s24 }
  0x29   : > { %s1204_s25 = scalar_select %p59_p8, %s1058_s11, %s61_s17  }
  0x2a   : > { %s954_s30 = scalar_lea.hbm %s1199_s19, 1536  ;;  %p956_p13 = pneg %p1169_p2 }
  0x2b   : > { %p955_p9 = scmp.ne.s32.totalorder %s1199_s19, %s954_s30  ;;  %s959_s6 = scalar_lea.hbm %s1603_s1, 3072 }
  0x2c   : > { %p960_p10 = scmp.lt.u32.totalorder %s1199_s19, %s1603_s1  ;;  %p961_p11 = scmp.lt.u32.totalorder %s959_s6, %s954_s30 }
  0x2d   : > { %p957_p4 = pnand %p956_p13, %p955_p9  ;;  %p963_p0 = scmp.lt.u32.totalorder %s954_s30, %s1199_s19 }
  0x2e   : > { %p962_p5 = por %p961_p11, %p960_p10 }
  0x2f   : > { %p958_p6 = pneg %p957_p4 }
  0x30   : > { %p964_p1 = por %p963_p0, %p962_p5 }
  0x32   : > { %p965_p8 = pnand %p964_p1, %p958_p6 }
  0x34   : > { %968 = shalt.err (!%p965_p8)
}
  0x35   : > { %s969_s17 = scalar_lea.vmem %s1206_s24, 1536  ;;  %s1073_s3 = smov [#allocation6]  }
  0x36   : > { %p970_p9 = scmp.ne.s32.totalorder %s1206_s24, %s969_s17  ;;  %s974_s15 = sshll.u32 %s1073_s3, 4  ;;  %s975_s15 = int_to_ptr.vmem [resolvable:$false] %s974_s15 }
  0x37   : > { %s976_s16 = scalar_lea.vmem %s975_s15, 3072  ;;  %p977_p3 = scmp.lt.s32.totalorder %s1206_s24, %s975_s15 }
  0x38   : > { %p972_p4 = pnand %p970_p9, %p956_p13  ;;  %p978_p10 = scmp.lt.s32.totalorder %s976_s16, %s969_s17 }
  0x3a   : > { %p973_p7 = pneg %p972_p4  ;;  %p979_p11 = por %p978_p10, %p977_p3 }
  0x3c   : > { %p980_p5 = pnand %p979_p11, %p973_p7 }
  0x3e   : > { %983 = shalt.err (!%p980_p5)
}
  0x3f   : > { %s1074_s23 = smov 128   ;;  %s1075_s30 = smov 8  }
  0x40   : > { %869 = dma.hbm_to_vmem [thread:$0]  (!%p1169_p2), %s1199_s19, 1536, %s1206_s24, %s1208_s28, %s1074_s23, %s1074_s23, %s1075_s30  }
  0x41   : > { %162 = sbr.rel (%p1159_p12) target bundleno = 222 (0xde), region = 28  ;;  %p1618_p13 = scmp.ne.s32.totalorder (!%p1159_p12), %s1609_s18, 0 }
  0x48   : > { %1037 = dma.done.wait (%p1618_p13), [#allocation5], 64  }
  0x49   : > { %1039 = vsyncadd (%p1618_p13), [#allocation5], 4294967232  ;;  %s1243_s4 = sand.u32 1, %s1054_s10   ;;  %p1619_p3 = scmp.ne.s32.totalorder %s1611_s20, 0 }
  0x4a   : > { %s852_s5 = smul.u32 96, %s1243_s4  ;;  %s169_s6 = scalar_lea.sflag [#allocation3], %s1243_s4 }
  0x4c   : > { %s1249_s27 = scalar_lea.vmem [#allocation6], %s852_s5 }
  0x4d   : > { %1041 = dma.done.wait (%p1619_p3), %s169_s6, 1536  }
  0x4e   : > { %1043 = vsyncadd (%p1619_p3), %s169_s6, 4294965760 }
  0x4f   : > { %177 = sfence }
  0x50   : > { %v213_v0 = vld [vmem:[%s1249_s27] sm:$0xff]  ;;  %s197_s18 = sshra.s32 %s1062_s12, 7  ;;  %s1260_s26 = sand.u32 127, %s1062_s12  ;;  %v214_v6 = vld [vmem:[%s1249_s27 + $0x8] sm:$0xff]  ;;  %v215_v10 = vld [vmem:[%s1249_s27 + $0x10] sm:$0xff] }
  0x51   : > { %v796_v1 = vld [vmem:[%s1249_s27 + $0x20] sm:$0xff]  ;;  %v217_v3 = vmul.f32 0.5, %v213_v0  ;;  %s1263_s20 = sshll.u32 %s197_s18, 7  ;;  %v218_v7 = vmul.f32 0.5, %v214_v6  ;;  %v797_v8 = vld [vmem:[%s1249_s27 + $0x28] sm:$0xff]  ;;  %v219_v17 = vmul.f32 0.5, %v215_v10 }
  0x52   : > { %v800_v2 = vld [vmem:[%s1249_s27 + $0x40] sm:$0xff]  ;;  %v230_v4 = vmul.f32 0.5, %v796_v1  ;;  %v801_v9 = vld [vmem:[%s1249_s27 + $0x48] sm:$0xff]  ;;  %s845_s19 = sadd.s32 128, %s1263_s20  ;;  %s847_s24 = sadd.s32 256, %s1263_s20  ;;  %v231_v14 = vmul.f32 0.5, %v797_v8 }
  0x53   : > { %v243_v5 = vmul.f32 0.5, %v800_v2  ;;  %v221_v11 = vadd.f32 0.5, %v217_v3  ;;  %s1271_s28 = sadd.s32 %s845_s19, %s1260_s26  ;;  %s207_s7 = sadd.s32 %s847_s24, %s1260_s26  ;;  %v222_v15 = vadd.f32 0.5, %v218_v7  ;;  %v244_v16 = vmul.f32 0.5, %v801_v9  ;;  %v798_v18 = vld [vmem:[%s1249_s27 + $0x30] sm:$0xff]  ;;  %v216_v20 = vld [vmem:[%s1249_s27 + $0x18] sm:$0xff] }
  0x54   : > { %v234_v12 = vadd.f32 0.5, %v230_v4  ;;  %v802_v19 = vld [vmem:[%s1249_s27 + $0x50] sm:$0xff]  ;;  %s208_s8 = sld [smem:[#allocation2 + %s207_s7]]  ;;  %v235_v22 = vadd.f32 0.5, %v231_v14  ;;  %v232_v23 = vmul.f32 0.5, %v798_v18  ;;  %v799_v25 = vld [vmem:[%s1249_s27 + $0x38] sm:$0xff] }
  0x55   : > { %v247_v13 = vadd.f32 0.5, %v243_v5  ;;  %v245_v24 = vmul.f32 0.5, %v802_v19  ;;  %v248_v26 = vadd.f32 0.5, %v244_v16  ;;  %v223_v27 = vadd.f32 0.5, %v219_v17  ;;  %v803_v33 = vld [vmem:[%s1249_s27 + $0x58] sm:$0xff]  ;;  %s849_s17 = sadd.s32 384, %s1263_s20 }
  0x56   : > { %v251_v21 = vmax.f32 %v221_v11, %v234_v12  ;;  %v220_v28 = vmul.f32 0.5, %v216_v20  ;;  %v233_v29 = vmul.f32 0.5, %v799_v25  ;;  %v252_v31 = vmax.f32 %v222_v15, %v235_v22  ;;  %s211_s3 = sadd.s32 %s849_s17, %s1260_s26  ;;  %s1399_s16 = sld [smem:[#allocation2 + %s1062_s12]] }
  0x57   : > { %v236_v32 = vadd.f32 0.5, %v232_v23  ;;  %v249_v34 = vadd.f32 0.5, %v245_v24  ;;  %v246_v37 = vmul.f32 0.5, %v803_v33  ;;  %s1382_s15 = sld [smem:[#allocation2 + %s211_s3]]  ;;  %s1503_s6 = scalar_lea.vmem [#allocation7], %s852_s5 }
  0x58   : > { %v255_v30 = vmax.f32 %v251_v21, %v247_v13  ;;  %v1279_v35 = vadd.f32 0.5, %v220_v28  ;;  %v1281_v36 = vadd.f32 0.5, %v233_v29  ;;  %v256_v41 = vmax.f32 %v252_v31, %v248_v26  ;;  %s204_s23 = sld [smem:[#allocation2 + %s1271_s28]]  ;;  %s853_s5 = smul.u32 1536, %s1062_s12 }
  0x59   : > { %v253_v42 = vmax.f32 %v223_v27, %v236_v32  ;;  %v1283_v43 = vadd.f32 0.5, %v246_v37  ;;  %s686_s27 = sshll.u32 %s1503_s6, 4  ;;  %s671_s12 = scalar_lea.sflag [#allocation4], %s1243_s4  ;;  %s1551_s27 = int_to_ptr.vmem [resolvable:$true] %s686_s27 }
  0x5a   : > { %v259_v38 = vsub.f32 %v255_v30, %v221_v11  ;;  %v280_v39 = vsub.f32 %v255_v30, %v234_v12  ;;  %v300_v40 = vsub.f32 %v255_v30, %v247_v13  ;;  %v254_v44 = vmax.f32 %v1279_v35, %v1281_v36  ;;  %s1549_s20 = scalar_lea.hbm %s1604_s2, %s853_s5  ;;  %s984_s19 = scalar_lea.vmem %s1551_s27, 1536 }
  0x5b   : > { %v1287_v45 = vstv %s208_s8  ;;  %v260_v46 = vsub.f32 %v256_v41, %v222_v15  ;;  %v281_v47 = vsub.f32 %v256_v41, %v235_v22  ;;  %v301_v51 = vsub.f32 %v256_v41, %v248_v26  ;;  %p985_p7 = scmp.ne.s32.totalorder %s1551_s27, %s984_s19  ;;  %p1620_p12 = scmp.ne.s32.totalorder %s1612_s21, 0 }
  0x5c   : > { %v264_v48 = vmul.f32 %v1287_v45, %v259_v38  ;;  %v284_v49 = vmul.f32 %v280_v39, %v1287_v45  ;;  %v304_v50 = vmul.f32 %v300_v40, %v1287_v45  ;;  %v257_v54 = vmax.f32 %v253_v42, %v249_v34  ;;  %s820_s30 = sadd.f32 -1.0, %s1399_s16  ;;  %s1076_s24 = smov [#allocation7]  }
  0x5d   : > { %v265_v52 = vmul.f32 %v1287_v45, %v260_v46  ;;  %v285_v53 = vmul.f32 %v281_v47, %v1287_v45  ;;  %v1295_v58 = vmax.f32 %v254_v44, %v1283_v43  ;;  %v305_v61 = vmul.f32 %v301_v51, %v1287_v45  ;;  %p986_p2 = pnand %p985_p7, %p1620_p12  ;;  %s988_s28 = sshll.u32 %s1076_s24, 4  ;;  %s989_s28 = int_to_ptr.vmem [resolvable:$false] %s988_s28 }
  0x5e   : > { %v268_v55 = vsub.f32 %v255_v30, %v264_v48  ;;  %v288_v56 = vsub.f32 %v255_v30, %v284_v49  ;;  %v308_v57 = vsub.f32 %v255_v30, %v304_v50  ;;  %v261_v62 = vsub.f32 %v257_v54, %v223_v27  ;;  %s990_s7 = scalar_lea.vmem %s989_s28, 3072  ;;  %p991_p0 = scmp.lt.s32.totalorder %s1551_s27, %s989_s28 }
  0x5f   : > { %v269_v59 = vsub.f32 %v256_v41, %v265_v52  ;;  %v289_v60 = vsub.f32 %v256_v41, %v285_v53  ;;  %v282_v2 = vsub.f32 %v257_v54, %v236_v32  ;;  %v309_v5 = vsub.f32 %v256_v41, %v305_v61  ;;  %p987_p6 = pneg %p986_p2  ;;  %p992_p1 = scmp.lt.s32.totalorder %s990_s7, %s984_s19 }
  0x60   : > { %v272_v63 = vmax.f32 %v268_v55, 0.0  ;;  %v292_v0 = vmax.f32 %v288_v56, 0.0  ;;  %v312_v1 = vmax.f32 %v308_v57, 0.0  ;;  %v266_v6 = vmul.f32 %v1287_v45, %v261_v62 }
  0x61   : > { %v273_v3 = vmax.f32 %v269_v59, 0.0  ;;  %v293_v4 = vmax.f32 %v289_v60, 0.0  ;;  %v286_v10 = vmul.f32 %v282_v2, %v1287_v45  ;;  %v313_v13 = vmax.f32 %v309_v5, 0.0  ;;  %p993_p8 = por %p992_p1, %p991_p0 }
  0x62   : > { %v1299_v7 = vmin.f32 %v272_v63, 1.0  ;;  %v1301_v8 = vmin.f32 %v292_v0, 1.0  ;;  %v1303_v9 = vmin.f32 %v312_v1, 1.0  ;;  %v270_v14 = vsub.f32 %v257_v54, %v266_v6 }
  0x63   : > { %v1306_v11 = vmin.f32 %v273_v3, 1.0  ;;  %v1308_v12 = vmin.f32 %v293_v4, 1.0  ;;  %v290_v17 = vsub.f32 %v257_v54, %v286_v10  ;;  %v302_v18 = vsub.f32 %v257_v54, %v249_v34  ;;  %p994_p9 = pnand %p993_p8, %p987_p6 }
  0x64   : > { %v320_v15 = vmax.f32 %v1299_v7, %v1301_v8  ;;  %v328_v16 = vmin.f32 %v1299_v7, %v1301_v8  ;;  %v1314_v19 = vmin.f32 %v313_v13, 1.0  ;;  %v274_v22 = vmax.f32 %v270_v14, 0.0 }
  0x65   : > { %v321_v20 = vmax.f32 %v1306_v11, %v1308_v12  ;;  %v329_v21 = vmin.f32 %v1306_v11, %v1308_v12  ;;  %v294_v27 = vmax.f32 %v290_v17, 0.0  ;;  %v306_v29 = vmul.f32 %v302_v18, %v1287_v45 }
  0x66   : > { %v1321_v23 = vmax.f32 %v320_v15, %v1303_v9  ;;  %v332_v24 = vmin.f32 %v328_v16, %v1303_v9  ;;  %v262_v30 = vsub.f32 %v1295_v58, %v1279_v35  ;;  %v1337_v32 = vmin.f32 %v274_v22, 1.0 }
  0x67   : > { %v1325_v25 = vmax.f32 %v321_v20, %v1314_v19  ;;  %v333_v26 = vmin.f32 %v329_v21, %v1314_v19  ;;  %v1342_v34 = vmin.f32 %v294_v27, 1.0  ;;  %v310_v38 = vsub.f32 %v257_v54, %v306_v29 }
  0x68   : > { %v1329_v28 = vsub.f32 %v1321_v23, %v332_v24  ;;  %v267_v35 = vmul.f32 %v1287_v45, %v262_v30  ;;  %v283_v40 = vsub.f32 %v1295_v58, %v1281_v36  ;;  %v303_v46 = vsub.f32 %v1295_v58, %v1283_v43 }
  0x69   : > { %v1335_v31 = vsub.f32 %v1325_v25, %v333_v26  ;;  %v322_v39 = vmax.f32 %v1337_v32, %v1342_v34  ;;  %v314_v41 = vmax.f32 %v310_v38, 0.0  ;;  %v330_v42 = vmin.f32 %v1337_v32, %v1342_v34 }
  0x6a   : > { %vm340_vm0 = vcmp.gt.f32.partialorder %v1329_v28, 0.0  ;;  %v271_v44 = vsub.f32 %v1295_v58, %v267_v35  ;;  %v287_v47 = vmul.f32 %v283_v40, %v1287_v45  ;;  %v307_v49 = vmul.f32 %v303_v46, %v1287_v45 }
  0x6b   : > { %v344_v33 = vsel %vm340_vm0, %v1329_v28, 1.0  ;;  %vm341_vm1 = vcmp.gt.f32.partialorder %v1335_v31, 0.0  ;;  %v1357_v48 = vmin.f32 %v314_v41, 1.0  ;;  %v356_v43 = vsub.f32 %v1321_v23, %v1299_v7 }
  0x6c   : > { %931 = vrcp.f32 %v344_v33  ;;  %v345_v37 = vsel %vm341_vm1, %v1335_v31, 1.0  ;;  %v291_v50 = vsub.f32 %v1295_v58, %v287_v47  ;;  %v275_v52 = vmax.f32 %v271_v44, 0.0 }
  0x6d   : > { %933 = vrcp.f32 %v345_v37  ;;  %v1363_v36 = vmax.f32 %v322_v39, %v1357_v48  ;;  %v334_v51 = vmin.f32 %v330_v42, %v1357_v48  ;;  %v311_v53 = vsub.f32 %v1295_v58, %v307_v49 }
  0x6e   : > { %v364_v54 = vsub.f32 %v1321_v23, %v1301_v8  ;;  %v372_v45 = vsub.f32 %v1321_v23, %v1303_v9  ;;  %v295_v55 = vmax.f32 %v291_v50, 0.0  ;;  %v357_v56 = vsub.f32 %v1325_v25, %v1306_v11 }
  0x6f   : > { %v365_v57 = vsub.f32 %v1325_v25, %v1308_v12  ;;  %v373_v59 = vsub.f32 %v1325_v25, %v1314_v19  ;;  %v1380_v58 = vsub.f32 %v1363_v36, %v334_v51  ;;  %vm380_vm2 = vcmp.eq.f32.partialorder %v1321_v23, %v1299_v7 }
  0x70   : > { %v315_v60 = vmax.f32 %v311_v53, 0.0  ;;  %vm388_vm3 = vcmp.eq.f32.partialorder %v1321_v23, %v1301_v8  ;;  %v1389_v62 = vmin.f32 %v275_v52, 1.0  ;;  %v1391_v63 = vmin.f32 %v295_v55, 1.0 }
  0x71   : > { %vm342_vm4 = vcmp.gt.f32.partialorder %v1380_v58, 0.0  ;;  %vm389_vm5 = vcmp.eq.f32.partialorder %v1325_v25, %v1308_v12  ;;  %vm381_vm6 = vcmp.eq.f32.partialorder %v1325_v25, %v1306_v11  ;;  %v1414_v30 = vstv %s1382_s15 }
  0x72   : > { %v346_v4 = vsel %vm342_vm4, %v1380_v58, 1.0  ;;  %v1396_v14 = vmin.f32 %v315_v60, 1.0  ;;  %v323_v18 = vmax.f32 %v1389_v62, %v1391_v63  ;;  %v331_v22 = vmin.f32 %v1389_v62, %v1391_v63 }
  0x73   : > { %935 = vrcp.f32 %v346_v4  ;;  %v358_v38 = vsub.f32 %v1363_v36, %v1337_v32  ;;  %v366_v8 = vsub.f32 %v1363_v36, %v1342_v34  ;;  %v374_v40 = vsub.f32 %v1363_v36, %v1357_v48 }
  0x74   : > { %v1408_v27 = vmax.f32 %v323_v18, %v1396_v14  ;;  %v335_v33 = vmin.f32 %v331_v22, %v1396_v14  ;;  %vm390_vm8 = vcmp.eq.f32.partialorder %v1363_v36, %v1342_v34  ;;  %vm382_vm9 = vcmp.eq.f32.partialorder %v1363_v36, %v1337_v32 }
  0x75   : > { %v1444_v60 = vstv %s204_s23 }
  0x76   : > { %v932_v61 = vpop.eup %931  ;;  %v1430_v41 = vsub.f32 %v1408_v27, %v335_v33  ;;  %vm383_vm10 = vcmp.eq.f32.partialorder %v1408_v27, %v1389_v62  ;;  %vm391_vm11 = vcmp.eq.f32.partialorder %v1408_v27, %v1391_v63 }
  0x77   : > { %v934_v0 = vpop.eup %933  ;;  %v360_v1 = vmul.f32 %v932_v61, %v356_v43  ;;  %v368_v2 = vmul.f32 %v932_v61, %v364_v54  ;;  %v376_v3 = vmul.f32 %v932_v61, %v372_v45  ;;  %v1438_v54 = vstv %s820_s30 }
  0x78   : > { %v361_v5 = vmul.f32 %v934_v0, %v357_v56  ;;  %v369_v6 = vmul.f32 %v934_v0, %v365_v57  ;;  %v377_v9 = vmul.f32 %v934_v0, %v373_v59  ;;  %vm343_vm7 = vcmp.gt.f32.partialorder %v1430_v41, 0.0 }
  0x79   : > { %v392_v10 = vadd.f32 2.0, %v360_v1  ;;  %v400_v13 = vadd.f32 4.0, %v368_v2  ;;  %v384_v15 = vsub.f32 %v376_v3, %v368_v2  ;;  %v347_v46 = vsel %vm343_vm7, %v1430_v41, 1.0 }
  0x7a   : > { %v393_v16 = vadd.f32 2.0, %v361_v5  ;;  %v401_v17 = vadd.f32 4.0, %v369_v6  ;;  %v385_v21 = vsub.f32 %v377_v9, %v369_v6  ;;  %937 = vrcp.f32 %v347_v46 }
  0x7b   : > { %v396_v19 = vsub.f32 %v392_v10, %v376_v3  ;;  %v404_v20 = vsub.f32 %v400_v13, %v360_v1  ;;  %v359_v0 = vsub.f32 %v1408_v27, %v1389_v62  ;;  %v367_v1 = vsub.f32 %v1408_v27, %v1391_v63 }
  0x7c   : > { %v397_v24 = vsub.f32 %v393_v16, %v377_v9  ;;  %v405_v26 = vsub.f32 %v401_v17, %v361_v5 }
  0x7d   : > { %v408_v29 = vsel %vm388_vm3, %v396_v19, %v404_v20  ;;  %v936_v12 = vpop.eup %935 }
  0x7e   : > { %v412_v37 = vsel %vm380_vm2, %v384_v15, %v408_v29  ;;  %v409_v11 = vsel %vm389_vm5, %v397_v24, %v405_v26  ;;  %v362_v49 = vmul.f32 %v936_v12, %v358_v38  ;;  %v370_v50 = vmul.f32 %v936_v12, %v366_v8 }
  0x7f   : > { %v416_v35 = vmul.f32 0.16666667, %v412_v37  ;;  %v413_v39 = vsel %vm381_vm6, %v385_v21, %v409_v11  ;;  %v378_v51 = vmul.f32 %v936_v12, %v374_v40  ;;  %v375_v15 = vsub.f32 %v1408_v27, %v1396_v14 }
  0x80   : > { %v417_v7 = vmul.f32 0.16666667, %v413_v39  ;;  %v394_v53 = vadd.f32 2.0, %v362_v49  ;;  %v402_v43 = vadd.f32 4.0, %v370_v50 }
  0x81   : > { %v421_v42 = vadd.f32 %v1414_v30, %v416_v35  ;;  %v386_v55 = vsub.f32 %v378_v51, %v370_v50 }
  0x82   : > { %v422_v44 = vadd.f32 %v1414_v30, %v417_v7  ;;  %v398_v57 = vsub.f32 %v394_v53, %v378_v51  ;;  %v406_v59 = vsub.f32 %v402_v43, %v362_v49 }
  0x83   : > { %v425_v47 = vfloor.f32 %v421_v42 }
  0x84   : > { %v426_v48 = vfloor.f32 %v422_v44  ;;  %v410_v3 = vsel %vm390_vm8, %v398_v57, %v406_v59  ;;  %v938_v24 = vpop.eup %937 }
  0x85   : > { %v429_v52 = vsub.f32 %v421_v42, %v425_v47  ;;  %v414_v6 = vsel %vm382_vm9, %v386_v55, %v410_v3  ;;  %v363_v38 = vmul.f32 %v938_v24, %v359_v0  ;;  %v371_v8 = vmul.f32 %v938_v24, %v367_v1 }
  0x86   : > { %v430_v45 = vsub.f32 %v422_v44, %v426_v48  ;;  %v418_v13 = vmul.f32 0.16666667, %v414_v6  ;;  %v379_v39 = vmul.f32 %v938_v24, %v375_v15 }
  0x87   : > { %v433_v56 = vmul.f32 6.0, %v429_v52  ;;  %v395_v44 = vadd.f32 2.0, %v363_v38  ;;  %v403_v46 = vadd.f32 4.0, %v371_v8 }
  0x88   : > { %v434_v61 = vmul.f32 6.0, %v430_v45  ;;  %v423_v21 = vadd.f32 %v1414_v30, %v418_v13  ;;  %v387_v49 = vsub.f32 %v379_v39, %v371_v8 }
  0x89   : > { %v804_v2 = vadd.f32 -3.0, %v433_v56  ;;  %v812_v4 = vadd.f32 -2.0, %v433_v56  ;;  %v816_v5 = vadd.f32 -4.0, %v433_v56  ;;  %v399_v53 = vsub.f32 %v395_v44, %v379_v39 }
  0x8a   : > { %v805_v34 = vadd.f32 -3.0, %v434_v61  ;;  %v813_v9 = vadd.f32 -2.0, %v434_v61  ;;  %v1450_v10 = vadd.f32 -4.0, %v434_v61  ;;  %v427_v11 = vfloor.f32 %v423_v21 }
  0x8b   : > { %v441_v32 = vand.u32 2147483647, %v804_v2  ;;  %v461_v16 = vand.u32 2147483647, %v812_v4  ;;  %v481_v19 = vand.u32 2147483647, %v816_v5  ;;  %v407_v43 = vsub.f32 %v403_v46, %v363_v38 }
  0x8c   : > { %v442_v17 = vand.u32 2147483647, %v805_v34  ;;  %v462_v18 = vand.u32 2147483647, %v813_v9  ;;  %v482_v14 = vand.u32 2147483647, %v1450_v10  ;;  %v431_v12 = vsub.f32 %v423_v21, %v427_v11 }
  0x8d   : > { %v808_v20 = vadd.f32 -1.0, %v441_v32  ;;  %v465_v22 = vsub.f32 2.0, %v461_v16  ;;  %v485_v33 = vsub.f32 2.0, %v481_v19  ;;  %v411_v0 = vsel %vm391_vm11, %v399_v53, %v407_v43 }
  0x8e   : > { %v809_v26 = vadd.f32 -1.0, %v442_v17  ;;  %v466_v29 = vsub.f32 2.0, %v462_v18  ;;  %v1460_v52 = vmul.f32 6.0, %v431_v12  ;;  %v415_v3 = vsel %vm383_vm10, %v387_v49, %v411_v0 }
  0x8f   : > { %v449_v37 = vmax.f32 %v808_v20, 0.0  ;;  %v469_v40 = vmax.f32 %v465_v22, 0.0  ;;  %v489_v57 = vmax.f32 %v485_v33, 0.0  ;;  %v419_v9 = vmul.f32 0.16666667, %v415_v3 }
  0x90   : > { %v450_v35 = vmax.f32 %v809_v26, 0.0  ;;  %v470_v7 = vmax.f32 %v466_v29, 0.0  ;;  %v806_v61 = vadd.f32 -3.0, %v1460_v52  ;;  %v814_v1 = vadd.f32 -2.0, %v1460_v52 }
  0x91   : > { %v453_v42 = vmin.f32 %v449_v37, 1.0  ;;  %v473_v50 = vmin.f32 %v469_v40, 1.0  ;;  %v493_v16 = vmin.f32 %v489_v57, 1.0  ;;  %v424_v62 = vadd.f32 %v1414_v30, %v419_v9 }
  0x92   : > { %v454_v47 = vmin.f32 %v450_v35, 1.0  ;;  %v474_v51 = vmin.f32 %v470_v7, 1.0  ;;  %v443_v6 = vand.u32 2147483647, %v806_v61  ;;  %v463_v32 = vand.u32 2147483647, %v814_v1 }
  0x93   : > { %v497_v48 = vsub.f32 1.0, %v453_v42  ;;  %v517_v55 = vsub.f32 1.0, %v473_v50  ;;  %v537_v24 = vsub.f32 1.0, %v493_v16  ;;  %v428_v33 = vfloor.f32 %v424_v62 }
  0x94   : > { %v498_v45 = vsub.f32 1.0, %v454_v47  ;;  %v518_v56 = vsub.f32 1.0, %v474_v51  ;;  %v810_v18 = vadd.f32 -1.0, %v443_v6  ;;  %v467_v19 = vsub.f32 2.0, %v463_v32 }
  0x95   : > { %v501_v59 = vmul.f32 %v497_v48, %v1329_v28  ;;  %v521_v4 = vmul.f32 %v517_v55, %v1329_v28  ;;  %v541_v35 = vmul.f32 %v537_v24, %v1329_v28  ;;  %v432_v7 = vsub.f32 %v424_v62, %v428_v33 }
  0x96   : > { %v502_v2 = vmul.f32 %v498_v45, %v1335_v31  ;;  %v522_v5 = vmul.f32 %v518_v56, %v1335_v31  ;;  %v451_v29 = vmax.f32 %v810_v18, 0.0  ;;  %v471_v37 = vmax.f32 %v467_v19, 0.0 }
  0x97   : > { %v505_v34 = vsub.f32 %v1321_v23, %v501_v59  ;;  %v525_v13 = vsub.f32 %v1321_v23, %v521_v4  ;;  %v545_v46 = vsub.f32 %v1321_v23, %v541_v35  ;;  %v1485_v50 = vmul.f32 6.0, %v432_v7 }
  0x98   : > { %v506_v63 = vsub.f32 %v1325_v25, %v502_v2  ;;  %v526_v15 = vsub.f32 %v1325_v25, %v522_v5  ;;  %v455_v40 = vmin.f32 %v451_v29, 1.0  ;;  %v475_v42 = vmin.f32 %v471_v37, 1.0 }
  0x99   : > { %v509_v17 = vmax.f32 %v505_v34, 0.0  ;;  %v529_v21 = vmax.f32 %v525_v13, 0.0  ;;  %v1487_v43 = vmax.f32 %v545_v46, 0.0  ;;  %v807_v56 = vadd.f32 -3.0, %v1485_v50 }
  0x9a   : > { %v510_v20 = vmax.f32 %v506_v63, 0.0  ;;  %v530_v22 = vmax.f32 %v526_v15, 0.0  ;;  %v499_v49 = vsub.f32 1.0, %v455_v40  ;;  %v519_v51 = vsub.f32 1.0, %v475_v42 }
  0x9b   : > { %v513_v26 = vmin.f32 %v509_v17, 1.0  ;;  %v533_v38 = vmin.f32 %v529_v21, 1.0  ;;  %v815_v0 = vadd.f32 -2.0, %v1485_v50  ;;  %v444_v3 = vand.u32 2147483647, %v807_v56 }
  0x9c   : > { %v514_v11 = vmin.f32 %v510_v20, 1.0  ;;  %v534_v8 = vmin.f32 %v530_v22, 1.0  ;;  %v503_v55 = vmul.f32 %v499_v49, %v1380_v58  ;;  %v523_v57 = vmul.f32 %v519_v51, %v1380_v58 }
  0x9d   : > { %v558_v39 = vmul.f32 %v1444_v60, %v513_v26  ;;  %v570_v12 = vmul.f32 %v1444_v60, %v533_v38  ;;  %v464_v9 = vand.u32 2147483647, %v815_v0  ;;  %v811_v13 = vadd.f32 -1.0, %v444_v3 }
  0x9e   : > { %v559_v30 = vmul.f32 %v1444_v60, %v514_v11  ;;  %v571_v44 = vmul.f32 %v1444_v60, %v534_v8  ;;  %v507_v2 = vsub.f32 %v1363_v36, %v503_v55  ;;  %v527_v4 = vsub.f32 %v1363_v36, %v523_v57 }
  0x9f   : > { %v562_v47 = vmax.f32 %v558_v39, 0.0  ;;  %v574_v28 = vmax.f32 %v570_v12, 0.0  ;;  %v468_v62 = vsub.f32 2.0, %v464_v9  ;;  %v452_v21 = vmax.f32 %v811_v13, 0.0 }
  0xa0   : > { %v563_v48 = vmax.f32 %v559_v30, 0.0  ;;  %v575_v53 = vmax.f32 %v571_v44, 0.0  ;;  %v511_v63 = vmax.f32 %v507_v2, 0.0  ;;  %v531_v15 = vmax.f32 %v527_v4, 0.0 }
  0xa1   : > { %v566_v45 = vmin.f32 %v562_v47, 1.0  ;;  %v578_v61 = vmin.f32 %v574_v28, 1.0  ;;  %v472_v33 = vmax.f32 %v468_v62, 0.0  ;;  %v456_v38 = vmin.f32 %v452_v21, 1.0 }
  0xa2   : > { %v567_v59 = vmin.f32 %v563_v48, 1.0  ;;  %v579_v23 = vmin.f32 %v575_v53, 1.0  ;;  %v515_v20 = vmin.f32 %v511_v63, 1.0  ;;  %v535_v22 = vmin.f32 %v531_v15, 1.0 }
  0xa3   : > { %v596_v1 = vadd.f32 %v1438_v54, %v566_v45  ;;  %v608_v34 = vadd.f32 %v1438_v54, %v578_v61  ;;  %v476_v7 = vmin.f32 %v472_v33, 1.0  ;;  %v500_v12 = vsub.f32 1.0, %v456_v38 }
  0xa4   : > { %v597_v5 = vadd.f32 %v1438_v54, %v567_v59  ;;  %v609_v6 = vadd.f32 %v1438_v54, %v579_v23  ;;  %v560_v11 = vmul.f32 %v1444_v60, %v515_v20  ;;  %v572_v8 = vmul.f32 %v1444_v60, %v535_v22 }
  0xa5   : > { %v600_v32 = vmax.f32 %v596_v1, 0.0  ;;  %v612_v17 = vmax.f32 %v608_v34, 0.0  ;;  %v520_v51 = vsub.f32 1.0, %v476_v7  ;;  %v504_v28 = vmul.f32 %v500_v12, %v1430_v41 }
  0xa6   : > { %v601_v16 = vmax.f32 %v597_v5, 0.0  ;;  %v613_v18 = vmax.f32 %v609_v6, 0.0  ;;  %v564_v30 = vmax.f32 %v560_v11, 0.0  ;;  %v576_v44 = vmax.f32 %v572_v8, 0.0 }
  0xa7   : > { %v604_v19 = vmin.f32 %v600_v32, 1.0  ;;  %v616_v26 = vmin.f32 %v612_v17, 1.0  ;;  %v553_v45 = vmin.f32 %v1487_v43, 1.0  ;;  %v524_v55 = vmul.f32 %v520_v51, %v1430_v41 }
  0xa8   : > { %v605_v24 = vmin.f32 %v601_v16, 1.0  ;;  %v617_v29 = vmin.f32 %v613_v18, 1.0  ;;  %v568_v48 = vmin.f32 %v564_v30, 1.0  ;;  %v580_v53 = vmin.f32 %v576_v44, 1.0 }
  0xa9   : > { %v632_v37 = vmul.f32 2.0, %v604_v19  ;;  %v644_v39 = vmul.f32 2.0, %v616_v26  ;;  %v486_v56 = vsub.f32 2.0, %v482_v14  ;;  %v818_v57 = vadd.f32 -4.0, %v1460_v52 }
  0xaa   : > { %v633_v35 = vmul.f32 2.0, %v605_v24  ;;  %v645_v40 = vmul.f32 2.0, %v617_v29  ;;  %v819_v59 = vadd.f32 -4.0, %v1485_v50  ;;  %v598_v61 = vadd.f32 %v1438_v54, %v568_v48 }
  0xab   : > { %v821_v42 = vadd.f32 -1.0, %v632_v37  ;;  %v825_v47 = vadd.f32 -1.0, %v644_v39  ;;  %v508_v23 = vsub.f32 %v1408_v27, %v504_v28  ;;  %v610_v0 = vadd.f32 %v1438_v54, %v580_v53 }
  0xac   : > { %v822_v46 = vadd.f32 -1.0, %v633_v35  ;;  %v826_v49 = vadd.f32 -1.0, %v645_v40  ;;  %v582_v43 = vmul.f32 %v1444_v60, %v553_v45  ;;  %v528_v1 = vsub.f32 %v1408_v27, %v524_v55 }
  0xad   : > { %640 = vst [vmem:[%s1503_s6] sm:$0xff] %v821_v42  ;;  %829 = vst [vmem:[%s1503_s6 + $0x20] sm:$0xff] %v825_v47  ;;  %v490_v2 = vmax.f32 %v486_v56, 0.0  ;;  %v483_v3 = vand.u32 2147483647, %v818_v57  ;;  %v484_v4 = vand.u32 2147483647, %v819_v59 }
  0xae   : > { %641 = vst [vmem:[%s1503_s6 + $0x8] sm:$0xff] %v822_v46  ;;  %830 = vst [vmem:[%s1503_s6 + $0x28] sm:$0xff] %v826_v49  ;;  %v602_v5 = vmax.f32 %v598_v61, 0.0  ;;  %v512_v10 = vmax.f32 %v508_v23, 0.0  ;;  %v614_v14 = vmax.f32 %v610_v0, 0.0  ;;  %v586_v34 = vmax.f32 %v582_v43, 0.0 }
  0xaf   : > { %v532_v52 = vmax.f32 %v528_v1, 0.0  ;;  %v494_v6 = vmin.f32 %v490_v2, 1.0  ;;  %v487_v50 = vsub.f32 2.0, %v483_v3  ;;  %v488_v9 = vsub.f32 2.0, %v484_v4 }
  0xb0   : > { %v606_v32 = vmin.f32 %v602_v5, 1.0  ;;  %v516_v63 = vmin.f32 %v512_v10, 1.0  ;;  %v618_v13 = vmin.f32 %v614_v14, 1.0  ;;  %v590_v15 = vmin.f32 %v586_v34, 1.0 }
  0xb1   : > { %v536_v16 = vmin.f32 %v532_v52, 1.0  ;;  %v538_v17 = vsub.f32 1.0, %v494_v6  ;;  %v491_v18 = vmax.f32 %v487_v50, 0.0  ;;  %v492_v62 = vmax.f32 %v488_v9, 0.0 }
  0xb2   : > { %v634_v19 = vmul.f32 2.0, %v606_v32  ;;  %v561_v20 = vmul.f32 %v1444_v60, %v516_v63  ;;  %v646_v21 = vmul.f32 2.0, %v618_v13  ;;  %v620_v22 = vadd.f32 %v1438_v54, %v590_v15 }
  0xb3   : > { %v573_v24 = vmul.f32 %v1444_v60, %v536_v16  ;;  %v542_v26 = vmul.f32 %v538_v17, %v1335_v31  ;;  %v495_v29 = vmin.f32 %v491_v18, 1.0  ;;  %v496_v33 = vmin.f32 %v492_v62, 1.0 }
  0xb4   : > { %v823_v37 = vadd.f32 -1.0, %v634_v19  ;;  %v565_v11 = vmax.f32 %v561_v20, 0.0  ;;  %v827_v38 = vadd.f32 -1.0, %v646_v21  ;;  %v624_v8 = vmax.f32 %v620_v22, 0.0 }
  0xb5   : > { %v577_v35 = vmax.f32 %v573_v24, 0.0  ;;  %v546_v39 = vsub.f32 %v1325_v25, %v542_v26  ;;  %v539_v40 = vsub.f32 1.0, %v495_v29  ;;  %v540_v7 = vsub.f32 1.0, %v496_v33 }
  0xb6   : > { %642 = vst [vmem:[%s1503_s6 + $0x10] sm:$0xff] %v823_v37  ;;  %v569_v42 = vmin.f32 %v565_v11, 1.0  ;;  %831 = vst [vmem:[%s1503_s6 + $0x30] sm:$0xff] %v827_v38  ;;  %v628_v30 = vmin.f32 %v624_v8, 1.0 }
  0xb7   : > { %v581_v12 = vmin.f32 %v577_v35, 1.0  ;;  %v550_v44 = vmax.f32 %v546_v39, 0.0  ;;  %v543_v31 = vmul.f32 %v539_v40, %v1380_v58  ;;  %v544_v46 = vmul.f32 %v540_v7, %v1430_v41 }
  0xb8   : > { %v599_v47 = vadd.f32 %v1438_v54, %v569_v42  ;;  %v657_v49 = vmul.f32 2.0, %v628_v30 }
  0xb9   : > { %v611_v51 = vadd.f32 %v1438_v54, %v581_v12  ;;  %v554_v48 = vmin.f32 %v550_v44, 1.0  ;;  %v547_v25 = vsub.f32 %v1363_v36, %v543_v31  ;;  %v548_v28 = vsub.f32 %v1408_v27, %v544_v46 }
  0xba   : > { %v603_v53 = vmax.f32 %v599_v47, 0.0  ;;  %v833_v45 = vadd.f32 -1.0, %v657_v49 }
  0xbb   : > { %v615_v55 = vmax.f32 %v611_v51, 0.0  ;;  %v583_v56 = vmul.f32 %v1444_v60, %v554_v48  ;;  %v551_v57 = vmax.f32 %v547_v25, 0.0  ;;  %v552_v59 = vmax.f32 %v548_v28, 0.0 }
  0xbc   : > { %v607_v58 = vmin.f32 %v603_v53, 1.0  ;;  %837 = vst [vmem:[%s1503_s6 + $0x40] sm:$0xff] %v833_v45 }
  0xbd   : > { %v619_v41 = vmin.f32 %v615_v55, 1.0  ;;  %v587_v61 = vmax.f32 %v583_v56, 0.0  ;;  %v555_v23 = vmin.f32 %v551_v57, 1.0  ;;  %v556_v0 = vmin.f32 %v552_v59, 1.0 }
  0xbe   : > { %v635_v43 = vmul.f32 2.0, %v607_v58 }
  0xbf   : > { %v647_v1 = vmul.f32 2.0, %v619_v41  ;;  %v591_v36 = vmin.f32 %v587_v61, 1.0  ;;  %v584_v27 = vmul.f32 %v1444_v60, %v555_v23  ;;  %v585_v2 = vmul.f32 %v1444_v60, %v556_v0 }
  0xc0   : > { %v824_v3 = vadd.f32 -1.0, %v635_v43 }
  0xc1   : > { %v828_v4 = vadd.f32 -1.0, %v647_v1  ;;  %v621_v5 = vadd.f32 %v1438_v54, %v591_v36  ;;  %v588_v10 = vmax.f32 %v584_v27, 0.0  ;;  %v589_v14 = vmax.f32 %v585_v2, 0.0 }
  0xc2   : > { %643 = vst [vmem:[%s1503_s6 + $0x18] sm:$0xff] %v824_v3 }
  0xc3   : > { %832 = vst [vmem:[%s1503_s6 + $0x38] sm:$0xff] %v828_v4  ;;  %v625_v34 = vmax.f32 %v621_v5, 0.0  ;;  %v592_v52 = vmin.f32 %v588_v10, 1.0  ;;  %v593_v6 = vmin.f32 %v589_v14, 1.0 }
  0xc5   : > { %v629_v50 = vmin.f32 %v625_v34, 1.0  ;;  %v622_v9 = vadd.f32 %v1438_v54, %v592_v52  ;;  %v623_v32 = vadd.f32 %v1438_v54, %v593_v6 }
  0xc7   : > { %v658_v60 = vmul.f32 2.0, %v629_v50  ;;  %v626_v63 = vmax.f32 %v622_v9, 0.0  ;;  %v627_v13 = vmax.f32 %v623_v32, 0.0 }
  0xc9   : > { %v834_v15 = vadd.f32 -1.0, %v658_v60  ;;  %v630_v16 = vmin.f32 %v626_v63, 1.0  ;;  %v631_v17 = vmin.f32 %v627_v13, 1.0 }
  0xcb   : > { %838 = vst [vmem:[%s1503_s6 + $0x48] sm:$0xff] %v834_v15  ;;  %v659_v18 = vmul.f32 2.0, %v630_v16  ;;  %v660_v62 = vmul.f32 2.0, %v631_v17 }
  0xcd   : > { %v835_v54 = vadd.f32 -1.0, %v659_v18  ;;  %v836_v19 = vadd.f32 -1.0, %v660_v62 }
  0xcf   : > { %839 = vst [vmem:[%s1503_s6 + $0x50] sm:$0xff] %v835_v54  ;;  %840 = vst [vmem:[%s1503_s6 + $0x58] sm:$0xff] %v836_v19 }
  0xd0   : > { %997 = shalt.err (!%p994_p9)
}
  0xd1   : > { %s998_s8 = scalar_lea.hbm %s1549_s20, 1536  ;;  %s1002_s15 = scalar_lea.hbm %s1604_s2, 3072 }
  0xd2   : > { %p999_p4 = scmp.ne.s32.totalorder %s1549_s20, %s998_s8  ;;  %p1003_p5 = scmp.lt.u32.totalorder %s1549_s20, %s1604_s2 }
  0xd3   : > { %p1004_p13 = scmp.lt.u32.totalorder %s1002_s15, %s998_s8  ;;  %p1006_p7 = scmp.lt.u32.totalorder %s998_s8, %s1549_s20 }
  0xd4   : > { %p1000_p10 = pnand %p999_p4, %p1620_p12 }
  0xd5   : > { %p1005_p3 = por %p1004_p13, %p1003_p5 }
  0xd6   : > { %p1001_p11 = pneg %p1000_p10 }
  0xd7   : > { %p1007_p2 = por %p1006_p7, %p1005_p3 }
  0xd9   : > { %p1008_p6 = pnand %p1007_p2, %p1001_p11 }
  0xdb   : > { %1011 = shalt.err (!%p1008_p6)
}
  0xdc   : > { %s1077_s30 = smov 128   ;;  %s1078_s6 = smov 8  }
  0xdd   : > { %860 = dma.vmem_to_hbm [thread:$0]  (%p1620_p12), %s1551_s27, 1536, %s1549_s20, %s671_s12, %s1077_s30, %s1077_s30, %s1078_s6  }
  0xde PF: > { %s701_s5 = sand.u32 1, %s1050_s9   ;;  %p1621_p0 = scmp.ne.s32.totalorder %s1613_s22, 0 }
  0xdf   : > { %p1622_p1 = scmp.ge.s32.totalorder %s1070_s14, 2  ;;  %s702_s18 = scalar_lea.sflag [#allocation4], %s701_s5 }
  0xe1   : > { %p871_p8 = pnand %p1622_p1, %p1621_p0 }
  0xe3   : > { %1045 = dma.done.wait (!%p871_p8), %s702_s18, 1536  }
  0xe4   : > { %1047 = vsyncadd (!%p871_p8), %s702_s18, 4294965760  ;;  %s19_s14 = sadd.s32 1, %s1070_s14   ;;  %s1623_s9 = smov %s1054_s10 }
  0xe5   : > { %p16_p9 = scmp.ge.s32.totalorder %s19_s14, 4   ;;  %s1624_s10 = smov %s1058_s11 }
  0xe6   : > { %s1625_s11 = smov %s1204_s25  ;;  %s1626_s12 = smov %s1066_s13 }
  0xe7   : > { %s1627_s13 = smov %s1629_s29  ;;  %18 = sbr.rel (!%p16_p9) target bundleno = 7 (0x7), region = 82 }
  0xee   :  { %707 = vsyncpa [#allocation3], 1 }
  0xef   :  { %709 = vsyncpa [#allocation3 + $0x1], 1 }
  0xf0   :  { %710 = vsyncpa [#allocation4], 1 }
  0xf1   :  { %712 = vsyncpa [#allocation4 + $0x1], 1 }
  0xf2   :  { %713 = vsyncpa [#allocation5], 1 }
  0xf3   :  { %715 = vsyncpa [#allocation5 + $0x1], 1 }

</bundles_post_ra>
